<compile_context>
chip_gen: v7x
topology: tpu7x:2x2x1
jax: 0.10.0
libtpu: 0.0.40
codegen_flags: <defaults>
</compile_context>

<pallas_src>
import jax
import jax.numpy as jnp
from jax import lax
from jax.experimental import pallas as pl
from jax.experimental.pallas import tpu as pltpu

LANES = 128
SUBLANES = 8
CHUNK_ROWS = 256                        # rows squared+accumulated per inner step (128 KiB f32)
DEFAULT_BLOCK_BYTES = 8 * 1024 * 1024   # per-DMA block target (8 MiB; 2x fits every chip's VMEM)
SMALL_INPUT_ELEMS = 1 << 18             # below this, plain fused XLA beats kernel launch cost


def _round_up(x: int, m: int) -> int:
    return (x + m - 1) // m * m


def _round_down(x: int, m: int) -> int:
    return (x // m) * m


def _make_sumsq_kernel(total_rows: int, rows_pb: int, chunk: int, tiles_per_part: int):
    """Sum-of-squares over a (total_rows, 128) view.

    Grid is (num_parts, tiles_per_part):
      axis 0 ("parallel")  -> partition (sharded across TensorCores on multi-TC chips)
      axis 1 ("arbitrary") -> reduction over blocks of `rows_pb` rows
    Output: one (1, 8, 128) f32 per-lane partial accumulator per partition.
    """
    n_chunks = rows_pb // chunk
    assert n_chunks * chunk == rows_pb and chunk % SUBLANES == 0

    def kernel(x_ref, o_ref):
        p = pl.program_id(0)
        i = pl.program_id(1)

        @pl.when(i == 0)
        def _init():
            o_ref[...] = jnp.zeros_like(o_ref)

        # Global tile index (unclamped).  The last real tile may be partial and
        # tiles past the end ("phantom" tiles from the parallel split) are
        # empty; both are handled by the row-granular mask below.
        t = p * tiles_per_part + i
        nvalid = jnp.clip(total_rows - t * rows_pb, 0, rows_pb)  # valid rows in this block

        # Hoisted loop-invariant iota (JAX does not CSE broadcast_in_dim).
        row_iota = lax.broadcasted_iota(jnp.int32, (chunk, LANES), 0)

        def chunk_body(c, acc):
            r0 = pl.multiple_of(c * chunk, chunk)
            xc = x_ref[pl.ds(r0, chunk), :]                       # (chunk, 128), native dtype
            xc = jnp.where(row_iota < (nvalid - r0), xc, 0).astype(jnp.float32)
            x2 = (xc * xc).reshape(chunk // SUBLANES, SUBLANES, LANES)
            return acc + jnp.sum(x2, axis=0)                      # VPU adds only

        acc = o_ref[0]                                            # (8, 128) resident accumulator
        acc = lax.fori_loop(0, n_chunks, chunk_body, acc, unroll=min(4, n_chunks))
        o_ref[0] = acc

    return kernel


def rmse_features_loss(feature_difference: jax.Array,
                       *,
                       block_bytes: int = DEFAULT_BLOCK_BYTES,
                       max_rows_per_block: int | None = None,
                       min_pallas_elems: int = SMALL_INPUT_ELEMS) -> jax.Array:
    """sum(feature_difference ** 2) as a scalar f32 (== mse_loss(x, 0, size_average=False))."""
    xf = feature_difference.reshape(-1)
    n = xf.shape[0]

    # Small-input fast path: fixed pallas_call launch/pipeline cost dwarfs the
    # actual HBM traffic; fused XLA slice+square+reduce wins outright.
    if n < max(min_pallas_elems, LANES):
        return jnp.sum(xf.astype(jnp.float32) ** 2)

    rows = n // LANES
    main = rows * LANES

    tail_ss = None
    if main != n:
        # <128-element ragged tail handled in plain JAX (negligible traffic).
        tail_ss = jnp.sum(xf[main:].astype(jnp.float32) ** 2)
        # TODO(synk): for sizes not divisible by 128 this prefix slice can
        # materialize one copy of the main part before the custom call;
        # element-granular in-kernel masking of the raw 1-D array would avoid
        # it but needs a riskier 1-D layout.  Divisible-by-128 sizes are free.
        x2d = xf[:main].reshape(rows, LANES)
    else:
        x2d = xf.reshape(rows, LANES)            # free view (contiguous)

    itemsize = x2d.dtype.itemsize

    # dtype-aware block sizing: target `block_bytes` of HBM per DMA block.
    if max_rows_per_block is None:
        max_rows_pb = max(CHUNK_ROWS,
                          _round_down(block_bytes // (LANES * itemsize), CHUNK_ROWS))
    else:
        max_rows_pb = max(SUBLANES, _round_up(max_rows_per_block, SUBLANES))

    rows_pb = min(max_rows_pb, _round_up(rows, SUBLANES))
    if rows_pb >= CHUNK_ROWS:
        rows_pb = _round_down(rows_pb, CHUNK_ROWS)
        chunk = CHUNK_ROWS
    else:
        chunk = rows_pb                            # single chunk, multiple of 8

    num_tiles = pl.cdiv(rows, rows_pb)
    num_parts = 2 if num_tiles >= 2 else 1         # shard across TCs on multi-core chips
    tiles_per_part = pl.cdiv(num_tiles, num_parts)

    kernel = _make_sumsq_kernel(rows, rows_pb, chunk, tiles_per_part)

    def in_index(p, i):
        t = p * tiles_per_part + i
        # Clamp phantom tile indices; their data is fully masked in the kernel.
        return (jnp.minimum(t, num_tiles - 1), 0)

    block_b = rows_pb * LANES * itemsize
    # 2x double-buffered input blocks + output/accumulator + headroom; explicit
    # so the per-generation default scoped-VMEM limits never bite.
    vmem_limit = int(min(max(2 * block_b + (8 << 20), 32 << 20), 56 << 20))

    partials = pl.pallas_call(
        kernel,
        out_shape=jax.ShapeDtypeStruct((num_parts, SUBLANES, LANES), jnp.float32),
        grid_spec=pltpu.PrefetchScalarGridSpec(
            num_scalar_prefetch=0,
            grid=(num_parts, tiles_per_part),
            in_specs=[pl.BlockSpec((rows_pb, LANES), in_index)],
            out_specs=pl.BlockSpec((1, SUBLANES, LANES), lambda p, i: (p, 0, 0)),
        ),
        compiler_params=pltpu.CompilerParams(
            # TODO(synk): on v7x verify the size-2 "parallel" axis is sharded
            # across both TensorCores (or switch to CORE_PARALLEL semantics).
            dimension_semantics=("parallel", "arbitrary"),
            vmem_limit_bytes=vmem_limit,
        ),
        cost_estimate=pl.CostEstimate(
            flops=2 * main,
            transcendentals=0,
            bytes_accessed=main * itemsize + num_parts * SUBLANES * LANES * 4,
        ),
    )(x2d)

    total = jnp.sum(partials)
    if tail_ss is not None:
        total = total + tail_ss
    return total


if __name__ == "__main__":
    key = jax.random.PRNGKey(0)
    k0, k1, k2 = jax.random.split(key, 3)

    # Primary example: NCHW feature-difference tensor [B, C, H, W] = [2, 4, 16, 16].
    feature_difference = jax.random.normal(k0, (2, 4, 16, 16), dtype=jnp.float32)
    ref = jnp.sum(feature_difference.astype(jnp.float32) ** 2)

    # Force the Pallas path even at this tiny size so the kernel is exercised.
    loss_fn = jax.jit(lambda x: rmse_features_loss(x, min_pallas_elems=0))
    loss = jax.block_until_ready(loss_fn(feature_difference))
    assert jnp.allclose(loss, ref, rtol=1e-5, atol=1e-5), (loss, ref)

    # Default entry point (small-input fast path) must agree.
    loss_default = jax.block_until_ready(jax.jit(rmse_features_loss)(feature_difference))
    assert jnp.allclose(loss_default, ref, rtol=1e-5, atol=1e-5), (loss_default, ref)

    # Size not a multiple of 128: exercises the ragged-tail JAX path + masked partial block.
    x_odd = jax.random.normal(k1, (3, 5, 7, 11), dtype=jnp.float32)      # 1155 elems
    got = jax.block_until_ready(
        jax.jit(lambda x: rmse_features_loss(x, min_pallas_elems=0))(x_odd))
    want = jnp.sum(x_odd.astype(jnp.float32) ** 2)
    assert jnp.allclose(got, want, rtol=1e-5, atol=1e-5), (got, want)

    # Tiny block size: multiple tiles, 2-way "parallel" partition, clamped phantom tile.
    x_multi = jax.random.normal(k2, (1, 4, 32, 40), dtype=jnp.float32)   # 5120 elems = 40 rows
    got = jax.block_until_ready(
        jax.jit(lambda x: rmse_features_loss(x, min_pallas_elems=0,
                                             max_rows_per_block=8))(x_multi))
    want = jnp.sum(x_multi.astype(jnp.float32) ** 2)
    assert jnp.allclose(got, want, rtol=1e-5, atol=1e-5), (got, want)

    # bf16 input: dtype-aware block sizing, f32 accumulation in-kernel.
    x_bf16 = jax.random.normal(k1, (2, 4, 32, 32), dtype=jnp.bfloat16)   # 8192 elems
    got = jax.block_until_ready(
        jax.jit(lambda x: rmse_features_loss(x, min_pallas_elems=0))(x_bf16))
    want = jnp.sum(x_bf16.astype(jnp.float32) ** 2)
    assert jnp.allclose(got, want, rtol=1e-2, atol=1e-2), (got, want)

    print("KERNEL_OK")
</pallas_src>

<mosaic_0001>
module attributes {stable_mosaic.version = 11 : i64} {
  func.func @kernel(%arg0: i32, %arg1: i32, %arg2: memref<16x128xf32, #tpu.memory_space<vmem>>, %arg3: memref<1x8x128xf32, #tpu.memory_space<vmem>>) attributes {dimension_semantics = [#tpu.dimension_semantics<parallel>, #tpu.dimension_semantics<arbitrary>], iteration_bounds = array<i64: 1, 1>, scalar_prefetch = 0 : i64, scratch_operands = 0 : i64, tpu.core_type = #tpu.core_type<tc>, window_params = [{transform_indices = @transform_0, window_bounds = array<i64: 16, 128>}, {transform_indices = @transform_1, window_bounds = array<i64: 1, 8, 128>}]} {
    %c0_i32 = arith.constant 0 : i32
    %0 = arith.cmpi eq, %arg1, %c0_i32 : i32
    %1 = arith.extui %0 : i1 to i32
    %c0_i32_0 = arith.constant 0 : i32
    %2 = arith.cmpi ne, %1, %c0_i32_0 : i32
    scf.if %2 {
      %cst_14 = arith.constant 0.000000e+00 : f32
      %29 = vector.broadcast %cst_14 : f32 to vector<1x8x128xf32>
      %c0_15 = arith.constant 0 : index
      %c0_16 = arith.constant 0 : index
      %c0_17 = arith.constant 0 : index
      %30 = vector.load %arg3[%c0_15, %c0_16, %c0_17] : memref<1x8x128xf32, #tpu.memory_space<vmem>>, vector<1x8x128xf32>
      tpu.vector_store %arg3[%c0_15, %c0_16, %c0_17], %29 {strides = array<i32>} : memref<1x8x128xf32, #tpu.memory_space<vmem>>, vector<1x8x128xf32>,
    } else {
    }
    %c1_i32 = arith.constant 1 : i32
    %3 = arith.muli %arg0, %c1_i32 : i32
    %4 = arith.addi %3, %arg1 : i32
    %c16_i32 = arith.constant 16 : i32
    %5 = arith.muli %4, %c16_i32 : i32
    %c16_i32_1 = arith.constant 16 : i32
    %6 = arith.subi %c16_i32_1, %5 : i32
    %c0_i32_2 = arith.constant 0 : i32
    %c16_i32_3 = arith.constant 16 : i32
    %7 = arith.maxsi %c0_i32_2, %6 : i32
    %8 = arith.minsi %c16_i32_3, %7 : i32
    %9 = tpu.iota {dimensions = array<i32: 0>} : vector<16x128xi32>
    %c0 = arith.constant 0 : index
    %c0_4 = arith.constant 0 : index
    %c0_5 = arith.constant 0 : index
    %10 = vector.load %arg3[%c0, %c0_4, %c0_5] : memref<1x8x128xf32, #tpu.memory_space<vmem>>, vector<1x8x128xf32>
    %11 = vector.shape_cast %10 : vector<1x8x128xf32> to vector<8x128xf32>
    %c0_i32_6 = arith.constant 0 : i32
    %c16_i32_7 = arith.constant 16 : i32
    %12 = arith.muli %c0_i32_6, %c16_i32_7 : i32
    %13 = tpu.assume_multiple %12, 16 : i32
    %14 = arith.index_cast %13 : i32 to index
    %c0_8 = arith.constant 0 : index
    %15 = vector.load %arg2[%14, %c0_8] : memref<16x128xf32, #tpu.memory_space<vmem>>, vector<16x128xf32>
    %16 = arith.subi %8, %13 : i32
    %17 = vector.broadcast %16 : i32 to vector<16x128xi32>
    %18 = arith.cmpi slt, %9, %17 : vector<16x128xi32>
    %c0_i32_9 = arith.constant 0 : i32
    %19 = arith.sitofp %c0_i32_9 : i32 to f32
    %20 = vector.broadcast %19 : f32 to vector<16x128xf32>
    %21 = arith.select %18, %15, %20 : vector<16x128xi1>, vector<16x128xf32>
    %22 = arith.mulf %21, %21 : vector<16x128xf32>
    %23 = vector.shape_cast %22 : vector<16x128xf32> to vector<2x8x128xf32>
    %cst = arith.constant dense<0.000000e+00> : vector<8x128xf32>
    %24 = vector.multi_reduction <add>, %23, %cst [0] : vector<2x8x128xf32> to vector<8x128xf32>
    %25 = arith.addf %11, %24 : vector<8x128xf32>
    %c1_i32_10 = arith.constant 1 : i32
    %c0_11 = arith.constant 0 : index
    %c0_12 = arith.constant 0 : index
    %c0_13 = arith.constant 0 : index
    %26 = vector.load %arg3[%c0_11, %c0_12, %c0_13] : memref<1x8x128xf32, #tpu.memory_space<vmem>>, vector<1x8x128xf32>
    %27 = vector.shape_cast %26 : vector<1x8x128xf32> to vector<8x128xf32>
    %28 = vector.shape_cast %25 : vector<8x128xf32> to vector<1x8x128xf32>
    tpu.vector_store %arg3[%c0_11, %c0_12, %c0_13], %28 {strides = array<i32>} : memref<1x8x128xf32, #tpu.memory_space<vmem>>, vector<1x8x128xf32>,
    return
  }
  func.func @transform_0(%arg0: i32, %arg1: i32) -> (i32, i32) {
    %c1_i32 = arith.constant 1 : i32
    %0 = arith.muli %arg0, %c1_i32 : i32
    %1 = arith.addi %0, %arg1 : i32
    %c0_i32 = arith.constant 0 : i32
    %2 = arith.minsi %1, %c0_i32 : i32
    %c0_i32_0 = arith.constant 0 : i32
    %c0_i32_1 = arith.constant 0 : i32
    return %2, %c0_i32_0 : i32, i32
  }
  func.func @transform_1(%arg0: i32, %arg1: i32) -> (i32, i32, i32) {
    %c0_i32 = arith.constant 0 : i32
    %c0_i32_0 = arith.constant 0 : i32
    %c0_i32_1 = arith.constant 0 : i32
    return %arg0, %c0_i32, %c0_i32_0 : i32, i32, i32
  }
}

</mosaic_0001>

<bundles_post_ra>
// kernel: _lambda_.1
= control target key start
LH: loop header
LB: loop body
LE: loop exit
PB: predicated region body
PF: predicated region fallthrough
CT: control target
= control target key end

     0   :  { %s99_s0 = inlined_call_operand.vmem [shape: f32[16,128], index: 0, kind: input, shape index: {}]   ;;  %s100_s1 = inlined_call_operand.vmem [shape: f32[1,8,128], index: 1, kind: output, shape index: {}]  }
   0x1   :  { %v56_v0 = vld [vmem:[%s99_s0] sm:$0xff]  ;;  %v57_v1 = vld [vmem:[%s99_s0 + $0x8] sm:$0xff] }
   0x2   :  { %v64_v2 = vmul.f32 %v56_v0, %v56_v0  ;;  %v65_v3 = vmul.f32 %v57_v1, %v57_v1 }
   0x4   :  { %v66_v4 = vadd.f32 %v65_v3, %v64_v2 }
   0x6   :  { %68 = vst [vmem:[%s100_s1] sm:$0xff] %v66_v4 }

</bundles_post_ra>
